<compile_context>
chip_gen: v7x
topology: tpu7x:2x2x1
jax: 0.10.0
libtpu: 0.0.40
codegen_flags: <defaults>
</compile_context>

<pallas_src>
import jax
import jax.numpy as jnp
from jax.experimental import pallas as pl
from jax.experimental.pallas import tpu as pltpu

HIGH_DIM = 128            # high_dim (channel dim of x_h and x_l)
LOW_DIM = 64              # low_dim
REDUC_RATIO = 2
RED_DIM = LOW_DIM // REDUC_RATIO   # d = 32 (reduced channel dim)
BATCH = 2
N_HIGH = 16               # tokens in x_h
N_LOW = 8                 # tokens in x_l
BN_EPS = 1e-5             # nn.BatchNorm1d default eps


def _pnl_kernel(xh_ref, xl_ref, wt_ref, wgp_ref, ww_ref,
                bt_ref, bgp_ref, bw_ref, o_ref):
    B, Nh, C = xh_ref.shape
    _, Nl, _ = xl_ref.shape
    d = wt_ref.shape[1]

    # Flatten (B, N, C) -> (B*N, C) so the projection matmuls use more MXU rows.
    xh = xh_ref[...].reshape(B * Nh, C)                                  # (B*Nh, C)
    xl = xl_ref[...].reshape(B * Nl, C)                                  # (B*Nl, C)

    # theta projection on x_h; fused g|phi projection on x_l (one matmul each).
    theta = jnp.dot(xh, wt_ref[...], preferred_element_type=jnp.float32) + bt_ref[...]
    gp = jnp.dot(xl, wgp_ref[...], preferred_element_type=jnp.float32) + bgp_ref[...]

    theta = theta.reshape(B, Nh, d)
    g = gp[:, :d].reshape(B, Nl, d)
    phi = gp[:, d:].reshape(B, Nl, d)

    # energy = bmm(theta, phi^T);  attention = energy / N_l  (constant scale).
    energy = jnp.einsum("bqd,bkd->bqk", theta, phi,
                        preferred_element_type=jnp.float32)              # (B, Nh, Nl)
    attn = energy * (1.0 / Nl)
    y = jnp.einsum("bqk,bkd->bqd", attn, g,
                   preferred_element_type=jnp.float32)                   # (B, Nh, d)

    # W conv (k=1) with eval-mode BatchNorm folded into the weight/bias.
    y = jnp.dot(y.reshape(B * Nh, d), ww_ref[...],
                preferred_element_type=jnp.float32) + bw_ref[...]        # (B*Nh, C)

    # Residual and write back in the original (B, Nh, C) layout.
    o_ref[...] = (y + xh).reshape(B, Nh, C).astype(o_ref.dtype)


def pnl_forward(x_h, x_l, p):
    """x_h: (B, N_h, C), x_l: (B, N_l, C) — same layout the PyTorch module takes."""
    B, Nh, C = x_h.shape
    _, Nl, _ = x_l.shape
    d = p["wt"].shape[0]

    # Pre-transpose conv weights to (C_in, C_out) so the kernel does x @ W.
    wt_t = p["wt"].T                                                     # (C, d)
    wgp_t = jnp.concatenate([p["wg"].T, p["wp"].T], axis=1)              # (C, 2d) = [g | phi]
    bt = p["bt"].reshape(1, d)
    bgp = jnp.concatenate([p["bg"], p["bp"]]).reshape(1, 2 * d)

    # Fold eval-mode BatchNorm1d into the W conv:  y_bn = y @ Ww_eff^T + bw_eff.
    s = p["bn_gamma"] / jnp.sqrt(p["bn_var"] + BN_EPS)                   # (C,)
    ww_eff_t = (p["ww"] * s[:, None]).T                                  # (d, C)
    bw_eff = ((p["bw"] - p["bn_mean"]) * s + p["bn_beta"]).reshape(1, C)

    vmem = pl.BlockSpec(memory_space=pltpu.MemorySpace.VMEM)
    return pl.pallas_call(
        _pnl_kernel,
        out_shape=jax.ShapeDtypeStruct((B, Nh, C), x_h.dtype),
        in_specs=[vmem] * 8,
        out_specs=vmem,
    )(x_h, x_l, wt_t, wgp_t, ww_eff_t, bt, bgp, bw_eff)


def pnl_reference(x_h, x_l, p):
    """Pure-JAX mirror of PNL.forward (eval-mode BatchNorm, un-folded)."""
    g_x = x_l @ p["wg"].T + p["bg"]                                      # (B, Nl, d)
    theta = x_h @ p["wt"].T + p["bt"]                                    # (B, Nh, d)
    phi = x_l @ p["wp"].T + p["bp"]                                      # (B, Nl, d)
    energy = jnp.einsum("bqd,bkd->bqk", theta, phi)                      # bmm(theta_x, phi_x)
    attn = energy / energy.shape[-1]
    y = jnp.einsum("bqk,bkd->bqd", attn, g_x)                            # (B, Nh, d)
    y = y @ p["ww"].T + p["bw"]                                          # Conv1d W (k=1)
    y = (y - p["bn_mean"]) / jnp.sqrt(p["bn_var"] + BN_EPS) * p["bn_gamma"] + p["bn_beta"]
    return y + x_h                                                       # (B, Nh, C)


def init_params(key):
    d, C = RED_DIM, HIGH_DIM
    ks = jax.random.split(key, 12)
    std = 0.05
    return {
        "wg": jax.random.normal(ks[0], (d, C), jnp.float32) * std,
        "bg": jax.random.normal(ks[1], (d,), jnp.float32) * std,
        "wt": jax.random.normal(ks[2], (d, C), jnp.float32) * std,
        "bt": jax.random.normal(ks[3], (d,), jnp.float32) * std,
        "wp": jax.random.normal(ks[4], (d, C), jnp.float32) * std,
        "bp": jax.random.normal(ks[5], (d,), jnp.float32) * std,
        "ww": jax.random.normal(ks[6], (C, d), jnp.float32) * std,
        "bw": jax.random.normal(ks[7], (C,), jnp.float32) * std,
        # NOTE: the module initializes BN weight/bias to 0 (which would make the
        # output trivially equal x_h); non-trivial values here exercise the math.
        "bn_gamma": 1.0 + 0.1 * jax.random.normal(ks[8], (C,), jnp.float32),
        "bn_beta": 0.1 * jax.random.normal(ks[9], (C,), jnp.float32),
        "bn_mean": 0.1 * jax.random.normal(ks[10], (C,), jnp.float32),
        "bn_var": 1.0 + 0.2 * jax.random.uniform(ks[11], (C,), jnp.float32),
    }


if __name__ == "__main__":
    key = jax.random.PRNGKey(0)
    kh, kl, kp = jax.random.split(key, 3)
    x_h = jax.random.normal(kh, (BATCH, N_HIGH, HIGH_DIM), jnp.float32)
    x_l = jax.random.normal(kl, (BATCH, N_LOW, HIGH_DIM), jnp.float32)
    params = init_params(kp)

    out = pnl_forward(x_h, x_l, params)
    out = jax.block_until_ready(out)

    ref = pnl_reference(x_h, x_l, params)
    assert out.shape == (BATCH, N_HIGH, HIGH_DIM)
    assert jnp.allclose(out, ref, atol=1e-4, rtol=1e-4), "mismatch vs pure-JAX reference"

    print("KERNEL_OK")
</pallas_src>

<mosaic_0001>
module attributes {stable_mosaic.version = 11 : i64} {
  func.func @_pnl_kernel(%arg0: memref<2x16x128xf32, #tpu.memory_space<vmem>>, %arg1: memref<2x8x128xf32, #tpu.memory_space<vmem>>, %arg2: memref<128x32xf32, #tpu.memory_space<vmem>>, %arg3: memref<128x64xf32, #tpu.memory_space<vmem>>, %arg4: memref<32x128xf32, #tpu.memory_space<vmem>>, %arg5: memref<1x32xf32, #tpu.memory_space<vmem>>, %arg6: memref<1x64xf32, #tpu.memory_space<vmem>>, %arg7: memref<1x128xf32, #tpu.memory_space<vmem>>, %arg8: memref<2x16x128xf32, #tpu.memory_space<vmem>>) attributes {dimension_semantics = [], scalar_prefetch = 0 : i64, scratch_operands = 0 : i64, tpu.core_type = #tpu.core_type<tc>} {
    %c0 = arith.constant 0 : index
    %c0_0 = arith.constant 0 : index
    %c0_1 = arith.constant 0 : index
    %0 = vector.load %arg0[%c0, %c0_0, %c0_1] : memref<2x16x128xf32, #tpu.memory_space<vmem>>, vector<2x16x128xf32>
    %1 = vector.shape_cast %0 : vector<2x16x128xf32> to vector<32x128xf32>
    %c0_2 = arith.constant 0 : index
    %c0_3 = arith.constant 0 : index
    %c0_4 = arith.constant 0 : index
    %2 = vector.load %arg1[%c0_2, %c0_3, %c0_4] : memref<2x8x128xf32, #tpu.memory_space<vmem>>, vector<2x8x128xf32>
    %3 = vector.shape_cast %2 : vector<2x8x128xf32> to vector<16x128xf32>
    %c0_5 = arith.constant 0 : index
    %c0_6 = arith.constant 0 : index
    %4 = vector.load %arg2[%c0_5, %c0_6] : memref<128x32xf32, #tpu.memory_space<vmem>>, vector<128x32xf32>
    %cst = arith.constant dense<0.000000e+00> : vector<32x32xf32>
    %5 = tpu.matmul %1, %4, %cst {dimension_numbers = #tpu.dot_dimension_numbers<[1], [0], [0], [1], [0, 0, 1, 1], [], []>} : vector<32x128xf32>, vector<128x32xf32>, vector<32x32xf32> -> vector<32x32xf32>
    %c0_7 = arith.constant 0 : index
    %c0_8 = arith.constant 0 : index
    %6 = vector.load %arg5[%c0_7, %c0_8] : memref<1x32xf32, #tpu.memory_space<vmem>>, vector<1x32xf32>
    %7 = vector.broadcast %6 : vector<1x32xf32> to vector<32x32xf32>
    %8 = arith.addf %5, %7 : vector<32x32xf32>
    %c0_9 = arith.constant 0 : index
    %c0_10 = arith.constant 0 : index
    %9 = vector.load %arg3[%c0_9, %c0_10] : memref<128x64xf32, #tpu.memory_space<vmem>>, vector<128x64xf32>
    %cst_11 = arith.constant dense<0.000000e+00> : vector<16x64xf32>
    %10 = tpu.matmul %3, %9, %cst_11 {dimension_numbers = #tpu.dot_dimension_numbers<[1], [0], [0], [1], [0, 0, 1, 1], [], []>} : vector<16x128xf32>, vector<128x64xf32>, vector<16x64xf32> -> vector<16x64xf32>
    %c0_12 = arith.constant 0 : index
    %c0_13 = arith.constant 0 : index
    %11 = vector.load %arg6[%c0_12, %c0_13] : memref<1x64xf32, #tpu.memory_space<vmem>>, vector<1x64xf32>
    %12 = vector.broadcast %11 : vector<1x64xf32> to vector<16x64xf32>
    %13 = arith.addf %10, %12 : vector<16x64xf32>
    %14 = vector.shape_cast %8 : vector<32x32xf32> to vector<2x16x32xf32>
    %15 = vector.extract_strided_slice %13 {offsets = [0, 0], sizes = [16, 32], strides = [1, 1]} : vector<16x64xf32> to vector<16x32xf32>
    %16 = vector.shape_cast %15 : vector<16x32xf32> to vector<2x8x32xf32>
    %17 = vector.extract_strided_slice %13 {offsets = [0, 32], sizes = [16, 32], strides = [1, 1]} : vector<16x64xf32> to vector<16x32xf32>
    %18 = vector.shape_cast %17 : vector<16x32xf32> to vector<2x8x32xf32>
    "tpu.trace_start"() <{level = 10 : i32, message = "bqd,bkd->bqk"}> : () -> ()
    %cst_14 = arith.constant dense<0.000000e+00> : vector<2x16x8xf32>
    %19 = tpu.matmul %14, %18, %cst_14 {dimension_numbers = #tpu.dot_dimension_numbers<[2], [2], [1], [1], [0, 0, 0, 1, 1, 1], [0], [0]>} : vector<2x16x32xf32>, vector<2x8x32xf32>, vector<2x16x8xf32> -> vector<2x16x8xf32>
    "tpu.trace_stop"() : () -> ()
    %cst_15 = arith.constant 1.250000e-01 : f32
    %20 = vector.broadcast %cst_15 : f32 to vector<2x16x8xf32>
    %21 = arith.mulf %19, %20 : vector<2x16x8xf32>
    "tpu.trace_start"() <{level = 10 : i32, message = "bqk,bkd->bqd"}> : () -> ()
    %cst_16 = arith.constant dense<0.000000e+00> : vector<2x16x32xf32>
    %22 = tpu.matmul %21, %16, %cst_16 {dimension_numbers = #tpu.dot_dimension_numbers<[2], [1], [1], [2], [0, 0, 0, 1, 1, 2], [0], [0]>} : vector<2x16x8xf32>, vector<2x8x32xf32>, vector<2x16x32xf32> -> vector<2x16x32xf32>
    "tpu.trace_stop"() : () -> ()
    %23 = vector.shape_cast %22 : vector<2x16x32xf32> to vector<32x32xf32>
    %c0_17 = arith.constant 0 : index
    %c0_18 = arith.constant 0 : index
    %24 = vector.load %arg4[%c0_17, %c0_18] : memref<32x128xf32, #tpu.memory_space<vmem>>, vector<32x128xf32>
    %cst_19 = arith.constant dense<0.000000e+00> : vector<32x128xf32>
    %25 = tpu.matmul %23, %24, %cst_19 {dimension_numbers = #tpu.dot_dimension_numbers<[1], [0], [0], [1], [0, 0, 1, 1], [], []>} : vector<32x32xf32>, vector<32x128xf32>, vector<32x128xf32> -> vector<32x128xf32>
    %c0_20 = arith.constant 0 : index
    %c0_21 = arith.constant 0 : index
    %26 = vector.load %arg7[%c0_20, %c0_21] : memref<1x128xf32, #tpu.memory_space<vmem>>, vector<1x128xf32>
    %27 = vector.broadcast %26 : vector<1x128xf32> to vector<32x128xf32>
    %28 = arith.addf %25, %27 : vector<32x128xf32>
    %29 = arith.addf %28, %1 : vector<32x128xf32>
    %30 = vector.shape_cast %29 : vector<32x128xf32> to vector<2x16x128xf32>
    %c0_22 = arith.constant 0 : index
    %c0_23 = arith.constant 0 : index
    %c0_24 = arith.constant 0 : index
    %31 = vector.load %arg8[%c0_22, %c0_23, %c0_24] : memref<2x16x128xf32, #tpu.memory_space<vmem>>, vector<2x16x128xf32>
    tpu.vector_store %arg8[%c0_22, %c0_23, %c0_24], %30 {strides = array<i32>} : memref<2x16x128xf32, #tpu.memory_space<vmem>>, vector<2x16x128xf32>,
    return
  }
}

</mosaic_0001>

<bundles_post_ra>
// kernel: tpu_custom_call.1
= control target key start
LH: loop header
LB: loop body
LE: loop exit
PB: predicated region body
PF: predicated region fallthrough
CT: control target
= control target key end

     0   :  { %s1220_s0 = inlined_call_operand.vmem [shape: f32[2,16,128], index: 0, kind: input, shape index: {}]   ;;  %s1221_s1 = inlined_call_operand.vmem [shape: f32[2,8,128], index: 1, kind: input, shape index: {}]   ;;  %s1222_s2 = inlined_call_operand.vmem [shape: f32[128,32], index: 2, kind: input, shape index: {}]   ;;  %s1223_s3 = inlined_call_operand.vmem [shape: f32[128,64], index: 3, kind: input, shape index: {}]   ;;  %s1224_s4 = inlined_call_operand.vmem [shape: f32[32,128], index: 4, kind: input, shape index: {}]   ;;  %s1225_s5 = inlined_call_operand.vmem [shape: f32[1,32], index: 5, kind: input, shape index: {}]   ;;  %s1226_s6 = inlined_call_operand.vmem [shape: f32[1,64], index: 6, kind: input, shape index: {}]   ;;  %s1227_s7 = inlined_call_operand.vmem [shape: f32[1,128], index: 7, kind: input, shape index: {}]   ;;  %s1228_s8 = inlined_call_operand.hbm [shape: f32[2,16,128], index: 8, kind: output, shape index: {}]  }
   0x1   :  { %v144_v0 = vld [vmem:[%s1223_s3] sm:$0xff]  ;;  %v145_v1 = vld [vmem:[%s1223_s3 + $0x8] sm:$0xff]  ;;  %v146_v2 = vld [vmem:[%s1223_s3 + $0x10] sm:$0xff] }
   0x2   :  { %v928_v3 = vpack.c.bf16 %v145_v1, %v144_v0  ;;  %v147_v4 = vld [vmem:[%s1223_s3 + $0x18] sm:$0xff]  ;;  %v148_v6 = vld [vmem:[%s1223_s3 + $0x20] sm:$0xff]  ;;  %v149_v7 = vld [vmem:[%s1223_s3 + $0x28] sm:$0xff] }
   0x3   :  { %v932_v5 = vpack.c.bf16 %v147_v4, %v146_v2  ;;  %v936_v8 = vpack.c.bf16 %v149_v7, %v148_v6  ;;  %v150_v9 = vld [vmem:[%s1223_s3 + $0x30] sm:$0xff]  ;;  %v151_v10 = vld [vmem:[%s1223_s3 + $0x38] sm:$0xff]  ;;  %v34_v11 = vld [vmem:[%s1221_s1] sm:$0xff] }
   0x4   :  { %929 = vmatprep.subr.bf16.mxu1 %v928_v3  ;;  %859 = vmatprep.mubr.f32.mxu1 %v34_v11  ;;  %v36_v12 = vld [vmem:[%s1222_s2] sm:$0xff]  ;;  %v37_v13 = vld [vmem:[%s1222_s2 + $0x8] sm:$0xff]  ;;  %v38_v14 = vld [vmem:[%s1222_s2 + $0x10] sm:$0xff]  ;;  %v940_v20 = vpack.c.bf16 %v151_v10, %v150_v9 }
   0x5   :  { %931 = vmatpush3.bf16.msra.mxu1 %v928_v3  ;;  %v896_v15 = vpack.c.bf16 %v37_v13, %v36_v12  ;;  %v39_v16 = vld [vmem:[%s1222_s2 + $0x18] sm:$0xff]  ;;  %v40_v18 = vld [vmem:[%s1222_s2 + $0x20] sm:$0xff]  ;;  %v41_v19 = vld [vmem:[%s1222_s2 + $0x28] sm:$0xff] }
   0x6   :  { %933 = vmatprep.subr.bf16.mxu1 %v932_v5  ;;  %v900_v17 = vpack.c.bf16 %v39_v16, %v38_v14  ;;  %v152_v21 = vld [vmem:[%s1223_s3 + $0x40] sm:$0xff]  ;;  %v153_v22 = vld [vmem:[%s1223_s3 + $0x48] sm:$0xff]  ;;  %v904_v23 = vpack.c.bf16 %v41_v19, %v40_v18  ;;  %v42_v25 = vld [vmem:[%s1222_s2 + $0x30] sm:$0xff] }
   0x7   :  { %897 = vmatprep.subr.bf16.mxu0 %v896_v15  ;;  %v1099_v24 = vld [vmem:[%s1220_s0] sm:$0xff]  ;;  %v43_v26 = vld [vmem:[%s1222_s2 + $0x38] sm:$0xff] }
   0x8   :  { %899 = vmatpush3.bf16.msra.mxu0 %v896_v15  ;;  %821 = vmatprep.mubr.f32.mxu0 %v1099_v24 }
   0x9   :  { %935 = vmatpush3.bf16.msra.mxu1 %v932_v5  ;;  %901 = vmatprep.subr.bf16.mxu0 %v900_v17 }
   0xa   :  { %937 = vmatprep.subr.bf16.mxu1 %v936_v8 }
   0xd   :  { %939 = vmatpush3.bf16.msra.mxu1 %v936_v8 }
   0xe   :  { %13 = vsyncpa [#allocation3], 0  ;;  %941 = vmatprep.subr.bf16.mxu1 %v940_v20  ;;  %v944_v27 = vpack.c.bf16 %v153_v22, %v152_v21  ;;  %v154_v28 = vld [vmem:[%s1223_s3 + $0x50] sm:$0xff]  ;;  %v155_v29 = vld [vmem:[%s1223_s3 + $0x58] sm:$0xff]  ;;  %903 = vmatpush3.bf16.msra.mxu0 %v900_v17  ;;  %v908_v30 = vpack.c.bf16 %v43_v26, %v42_v25  ;;  %s996_s14 = smov 96   ;;  %vm245_vm0 = vcmask 261120  }
   0xf   :  { %905 = vmatprep.subr.bf16.mxu0 %v904_v23  ;;  %v44_v31 = vld [vmem:[%s1222_s2 + $0x40] sm:$0xff]  ;;  %v45_v32 = vld [vmem:[%s1222_s2 + $0x48] sm:$0xff]  ;;  %v948_v33 = vpack.c.bf16 %v155_v29, %v154_v28  ;;  %v46_v37 = vld [vmem:[%s1222_s2 + $0x50] sm:$0xff]  ;;  %vm419_vm1 = vcmask 64512   ;;  %s997_s23 = smov [#allocation2]  }
  0x10   :  { %v156_v34 = vld [vmem:[%s1223_s3 + $0x60] sm:$0xff]  ;;  %v157_v35 = vld [vmem:[%s1223_s3 + $0x68] sm:$0xff]  ;;  %v912_v36 = vpack.c.bf16 %v45_v32, %v44_v31  ;;  %v47_v38 = vld [vmem:[%s1222_s2 + $0x58] sm:$0xff]  ;;  %s703_s24 = sshll.u32 %s997_s23, 4  ;;  %s704_s24 = int_to_ptr.vmem [resolvable:$true] %s703_s24 }
  0x11   :  { %943 = vmatpush3.bf16.msra.mxu1 %v940_v20  ;;  %v952_v39 = vpack.c.bf16 %v157_v35, %v156_v34  ;;  %v158_v40 = vld [vmem:[%s1223_s3 + $0x70] sm:$0xff]  ;;  %v159_v41 = vld [vmem:[%s1223_s3 + $0x78] sm:$0xff]  ;;  %v916_v42 = vpack.c.bf16 %v47_v38, %v46_v37  ;;  %v48_v43 = vld [vmem:[%s1222_s2 + $0x60] sm:$0xff]  ;;  %p977_p1 = scmp.lt.s32.totalorder %s704_s24, %s704_s24 }
  0x12   :  { %945 = vmatprep.subr.bf16.mxu1 %v944_v27  ;;  %907 = vmatpush3.bf16.msra.mxu0 %v904_v23  ;;  %v49_v44 = vld [vmem:[%s1222_s2 + $0x68] sm:$0xff]  ;;  %v956_v45 = vpack.c.bf16 %v159_v41, %v158_v40  ;;  %v50_v47 = vld [vmem:[%s1222_s2 + $0x70] sm:$0xff]  ;;  %v51_v48 = vld [vmem:[%s1222_s2 + $0x78] sm:$0xff] }
  0x13   :  { %909 = vmatprep.subr.bf16.mxu0 %v908_v30  ;;  %v920_v46 = vpack.c.bf16 %v49_v44, %v48_v43  ;;  %v924_v49 = vpack.c.bf16 %v51_v48, %v50_v47  ;;  %v35_v50 = vld [vmem:[%s1221_s1 + $0x8] sm:$0xff]  ;;  %v1161_v52 = vld [vmem:[%s1220_s0 + $0x10] sm:$0xff]  ;;  %v1168_v53 = vld [vmem:[%s1220_s0 + $0x18] sm:$0xff] }
  0x14   :  { %v1156_v51 = vld [vmem:[%s1220_s0 + $0x8] sm:$0xff]  ;;  %v715_v54 = vld [vmem:[%s1226_s6] ss:$0 sm:$0xff]  ;;  %v584_v10 = vld [vmem:[%s1224_s4 + $0x10] sm:$0xff] }
  0x15   :  { %947 = vmatpush3.bf16.msra.mxu1 %v944_v27  ;;  %v714_v58 = vld [vmem:[%s1225_s5] ss:$0 sm:$0xff]  ;;  %v583_v7 = vld [vmem:[%s1224_s4 + $0x8] sm:$0xff]  ;;  %v585_v11 = vld [vmem:[%s1224_s4 + $0x18] sm:$0xff] }
  0x16   :  { %949 = vmatprep.subr.bf16.mxu1 %v948_v33  ;;  %911 = vmatpush3.bf16.msra.mxu0 %v908_v30  ;;  %v582_v6 = vld [vmem:[%s1224_s4] sm:$0xff]  ;;  %v964_v15 = vpack.c.bf16 %v585_v11, %v584_v10 }
  0x17   :  { %913 = vmatprep.subr.bf16.mxu0 %v912_v36  ;;  %v960_v8 = vpack.c.bf16 %v583_v7, %v582_v6  ;;  %v726_v25 = vld [vmem:[%s1227_s7] ss:$0 sm:$0xff]  ;;  %s972_s7 = scalar_lea.vmem %s704_s24, 512 }
  0x18   :  { %p973_p0 = scmp.ne.s32.totalorder %s704_s24, %s972_s7  ;;  %p978_p2 = scmp.lt.s32.totalorder %s972_s7, %s972_s7 }
  0x19   :  { %951 = vmatpush3.bf16.msra.mxu1 %v948_v33 }
  0x1a   :  { %953 = vmatprep.subr.bf16.mxu1 %v952_v39  ;;  %915 = vmatpush3.bf16.msra.mxu0 %v912_v36  ;;  %p979_p3 = por %p978_p2, %p977_p1 }
  0x1b   :  { %917 = vmatprep.subr.bf16.mxu0 %v916_v42 }
  0x1c   :  { %p980_p4 = pnand %p979_p3, %p973_p0 }
  0x1d   :  { %955 = vmatpush3.bf16.msra.mxu1 %v952_v39 }
  0x1e   :  { %957 = vmatprep.subr.bf16.mxu1 %v956_v45  ;;  %919 = vmatpush3.bf16.msra.mxu0 %v916_v42 }
  0x1f   :  { %921 = vmatprep.subr.bf16.mxu0 %v920_v46 }
  0x21   :  { %959 = vmatpush3.bf16.msra.mxu1 %v956_v45 }
  0x22   :  { %923 = vmatpush3.bf16.msra.mxu0 %v920_v46 }
  0x23   :  { %925 = vmatprep.subr.bf16.mxu0 %v924_v49 }
  0x24   :  { %860 = vmatmul.mubr.f32.vlgmr.msra.gmra.mrb[0].mxu1 %v35_v50 }
  0x26   :  { %927 = vmatpush3.bf16.msra.mxu0 %v924_v49 }
  0x29   :  { %822 = vmatmul.mubr.f32.vlgmr.msra.gmra.mrb[0].mxu0 %v1156_v51 }
  0x2a   :  { %824 = vmatprep.mubr.f32.mxu0 %v1161_v52 }
  0x2d   :  { %825 = vmatmul.mubr.f32.gmra.mrb[2].mxu0 %v1168_v53 }
  0xf7   :  { %v861_v55 = vpop.f32.mrb[0].mxu1 }
  0xf8   :  { %v233_v56 = vpop.f32.mrb[1].mxu1  ;;  %v239_v59 = vadd.f32 %v861_v55, %v715_v54 }
  0xf9   :  { %v234_v57 = vadd.f32 %v715_v54, %v233_v56 }
  0xfb   :  { %243 = vrot.lane.b32.xlu0 %v234_v57, %s996_s14  ;;  %872 = vmatprep.subr.mxu1 %v234_v57 }
  0xfc   :  { %873 = vmatpush3.msra.mxu1 %v234_v57  ;;  %v823_v60 = vpop.f32.mrb[0].mxu0 }
  0xfd   :  { %v131_v61 = vadd.f32 %v823_v60, %v714_v58  ;;  %v125_v62 = vpop.f32.mrb[1].mxu0  ;;  %961 = vmatprep.subr.bf16.mxu1 %v960_v8 }
  0xfe   :  { %v126_v63 = vadd.f32 %v714_v58, %v125_v62 }
  0xff   :  { %330 = vrot.lane.b32.xlu0 %v239_v59, %s996_s14 }
 0x100   :  { %v826_v0 = vpop.f32.mrb[2].mxu0  ;;  %864 = vmatprep.mubr.msk.f32.mxu0 %vm245_vm0, %v126_v63 }
 0x101   :  { %v141_v1 = vadd.f32 %v826_v0, %v714_v58  ;;  %v135_v2 = vpop.f32.mrb[3].mxu0 }
 0x102   :  { %v136_v3 = vadd.f32 %v714_v58, %v135_v2 }
 0x16d   :  { %v244_v4 = vpop.permute.xlu0 %243 }
 0x16e   :  { %862 = vmatprep.subr.msk.mxu0 %vm245_vm0, %v244_v4 }
 0x16f   :  { %863 = vmatpush3.xpose.msk.msra.mxu0 %vm245_vm0, %v244_v4 }
 0x171   :  { %v331_v5 = vpop.permute.xlu0 %330 }
 0x172   :  { %865 = vmatmul.mubr.msk.f32.vlgmr.msra.gmra.mrb[4].mxu0 %vm245_vm0, %v131_v61  ;;  %867 = vmatprep.subr.msk.mxu0 %vm245_vm0, %v331_v5 }
 0x173   :  { %868 = vmatpush3.xpose.msk.msra.mxu0 %vm245_vm0, %v331_v5  ;;  %869 = vmatprep.mubr.msk.f32.mxu0 %vm245_vm0, %v136_v3 }
 0x174   :  { %877 = vmatprep.subr.mxu0 %v239_v59 }
 0x176   :  { %870 = vmatmul.mubr.msk.f32.vlgmr.msra.gmra.mrb[6].mxu0 %vm245_vm0, %v141_v1 }
 0x177   :  { %878 = vmatpush3.msra.mxu0 %v239_v59 }
 0x245   :  { %v866_v9 = vpop.f32.mrb[4].mxu0 }
 0x246   :  { %v320_v12 = vpop.f32.mrb[5].mxu0  ;;  %v416_v14 = vmul.f32 0.125, %v866_v9 }
 0x247   :  { %v415_v13 = vmul.f32 0.125, %v320_v12 }
 0x249   :  { %v871_v16 = vpop.f32.mrb[6].mxu0  ;;  %874 = vmatprep.mubr.msk.f32.mxu1 %vm419_vm1, %v415_v13 }
 0x24a   :  { %v406_v17 = vpop.f32.mrb[7].mxu0  ;;  %875 = vmatmul.mubr.msk.f32.vlgmr.msra.gmra.mrb[2].mxu1 %vm419_vm1, %v416_v14  ;;  %v418_v19 = vmul.f32 0.125, %v871_v16 }
 0x24b   :  { %v417_v18 = vmul.f32 0.125, %v406_v17  ;;  %963 = vmatpush3.bf16.msra.mxu1 %v960_v8 }
 0x24c   :  { %965 = vmatprep.subr.bf16.mxu1 %v964_v15 }
 0x24d   :  { %879 = vmatprep.mubr.msk.f32.mxu0 %vm419_vm1, %v417_v18 }
 0x24e   :  { %880 = vmatmul.mubr.msk.f32.vlgmr.msra.gmra.mrb[8].mxu0 %vm419_vm1, %v418_v19 }
 0x24f   :  { %967 = vmatpush3.bf16.msra.mxu1 %v964_v15 }
 0x31d   :  { %v876_v20 = vpop.f32.mrb[2].mxu1 }
 0x31e   :  { %v492_v21 = vpop.f32.mrb[3].mxu1 }
 0x31f   :  { %890 = vmatprep.mubr.msk.f32.mxu1 %vm245_vm0, %v492_v21 }
 0x320   :  { %891 = vmatmul.mubr.msk.f32.vlgmr.msra.gmra.mrb[4].mxu1 %vm245_vm0, %v876_v20 }
 0x321   :  { %v881_v22 = vpop.f32.mrb[8].mxu0 }
 0x322   :  { %v573_v23 = vpop.f32.mrb[9].mxu0 }
 0x323   :  { %893 = vmatprep.mubr.msk.f32.mxu1 %vm245_vm0, %v573_v23 }
 0x324   :  { %894 = vmatmul.mubr.msk.f32.gmra.mrb[6].mxu1 %vm245_vm0, %v881_v22 }
 0x3f3   :  { %v892_v26 = vpop.f32.mrb[4].mxu1 }
 0x3f4   :  { %v677_v27 = vadd.f32 %v892_v26, %v726_v25  ;;  %v671_v28 = vpop.f32.mrb[5].mxu1 }
 0x3f5   :  { %v672_v29 = vadd.f32 %v726_v25, %v671_v28 }
 0x3f6   :  { %v691_v30 = vadd.f32 %v677_v27, %v1156_v51 }
 0x3f7   :  { %v690_v31 = vadd.f32 %v672_v29, %v1099_v24  ;;  %v895_v32 = vpop.f32.mrb[6].mxu1 }
 0x3f8   :  { %695 = vst [vmem:[#allocation2 + $0x8] sm:$0xff] %v691_v30  ;;  %v687_v33 = vadd.f32 %v895_v32, %v726_v25  ;;  %v681_v34 = vpop.f32.mrb[7].mxu1 }
 0x3f9   :  { %694 = vst [vmem:[#allocation2] sm:$0xff] %v690_v31  ;;  %v682_v35 = vadd.f32 %v726_v25, %v681_v34 }
 0x3fa   :  { %v693_v36 = vadd.f32 %v687_v33, %v1168_v53 }
 0x3fb   :  { %v692_v37 = vadd.f32 %v682_v35, %v1161_v52 }
 0x3fc   :  { %697 = vst [vmem:[#allocation2 + $0x18] sm:$0xff] %v693_v36 }
 0x3fd   :  { %696 = vst [vmem:[#allocation2 + $0x10] sm:$0xff] %v692_v37 }
 0x3fe   :  { %983 = shalt.err (!%p980_p4)
}
 0x3ff   :  { %s984_s26 = scalar_lea.hbm %s1228_s8, 512 }
 0x400   :  { %p985_p5 = scmp.ne.s32.totalorder %s1228_s8, %s984_s26  ;;  %p988_p6 = scmp.lt.u32.totalorder %s984_s26, %s1228_s8 }
 0x402   :  { %p990_p7 = pnand %p988_p6, %p985_p5 }
 0x404   :  { %993 = shalt.err (!%p990_p7)
}
 0x405   :  { %s998_s9 = smov 128   ;;  %s999_s10 = smov 8  }
 0x406   :  { %709 = dma.vmem_to_hbm [thread:$0]  %s704_s24, 512, %s1228_s8, [#allocation3], %s998_s9, %s998_s9, %s999_s10  }
 0x407   :  { %994 = dma.done.wait [#allocation3], 512  }
 0x408   :  { %995 = vsyncadd [#allocation3], 4294966784 }
 0x409   :  { %713 = vsyncpa [#allocation3], 1 }

</bundles_post_ra>
